<compile_context>
chip_gen: v6e
topology: v6e:2x2x1
jax: 0.10.0
libtpu: 0.0.40
codegen_flags: <defaults>
</compile_context>

<pallas_src>
import jax
import jax.numpy as jnp
from jax.experimental import pallas as pl
from jax.experimental.pallas import tpu as pltpu

KS = (1, 3, 5, 7)
OUT_PER_BRANCH = 8
N_BRANCH = len(KS)
C_OUT = OUT_PER_BRANCH * N_BRANCH      # 32
BN_EPS = 1e-5


def _round_up(x, m):
    return ((x + m - 1) // m) * m


def _tri_ones(n):
    idx = jnp.arange(n)
    return (jnp.abs(idx[:, None] - idx[None, :]) <= 1).astype(jnp.float32)


def mscnn_gemm_kernel(wt_ref, pt_ref, o_ref):
    # wt_ref: (32, Kp)  resident folded weight (constant index_map -> stays in VMEM)
    # pt_ref: (Kp, TILE_M)  streamed, time-pooled, bias-augmented im2col patch columns
    # o_ref:  (32, TILE_M)  channel-major, lane-dense output (unmasked stores)
    o_ref[...] = jnp.dot(wt_ref[...], pt_ref[...],
                         preferred_element_type=jnp.float32)


def mscnn_forward(x, conv_ws, conv_bs, bn_gammas, bn_betas, bn_means, bn_vars,
                  window_size, features, compute_dtype=jnp.bfloat16):
    """x: (B, window_size, features). conv_ws[i]: (8, features, KS[i]), conv_bs[i]: (8,),
    bn_*[i]: (8,). Returns (B, 32, T) matching the torch module (eval-mode BatchNorm)."""
    B = x.shape[0]
    F, L = features, window_size
    stride = 10 if window_size % 10 == 0 else 16
    Ts = [(L - k) // stride + 1 for k in KS]
    if len(set(Ts)) != 1:
        raise ValueError(
            f"Branch output lengths {Ts} differ for window_size={window_size}; "
            "torch.cat in the original module would fail for this configuration.")
    T = Ts[0]
    PK = F * sum(KS)
    K_aug = PK + 2                        # + [rowsum(A_t)[t], 1] bias columns
    K_pad = _round_up(K_aug, 16)          # nice sublane multiple for bf16 packing
    hi = jax.lax.Precision.HIGHEST

    # ---- im2col patches (layout plumbing; windows never overlap because k <= stride) ----
    xr = x.reshape(B, F, L).astype(jnp.float32)          # torch .reshape semantics (not a transpose)
    pad = T * stride - L
    xp = jnp.pad(xr, ((0, 0), (0, 0), (0, pad)))
    xw = xp.reshape(B, F, T, stride)
    parts = [jnp.transpose(xw[..., :k], (0, 2, 1, 3)).reshape(B, T, F * k) for k in KS]
    patches = jnp.concatenate(parts, axis=-1)            # (B, T, PK)

    # ---- pre-fold the time-direction 3-tap avg pool into the patches (associativity) ----
    pp = jnp.pad(patches, ((0, 0), (1, 1), (0, 0)))
    q = pp[:, :-2] + pp[:, 1:-1] + pp[:, 2:]             # (B, T, PK)  == A_t @ P per batch

    # ---- combined block-diagonal conv weight (PK, 32) and packed bias (32,) ----
    cols, off = [], 0
    for bi, k in enumerate(KS):
        w2d = jnp.transpose(conv_ws[bi], (1, 2, 0)).reshape(F * k, OUT_PER_BRANCH)  # rows c*k+j
        cols.append(jnp.pad(w2d, ((off, PK - off - F * k), (0, 0))))
        off += F * k
    w_big = jnp.concatenate(cols, axis=1)                # (PK, 32)
    bias_all = jnp.concatenate(conv_bs)                  # (32,)

    # ---- channel-direction pool (block-diag tridiagonal), /9, eval-BatchNorm folds ----
    a_c = jnp.kron(jnp.eye(N_BRANCH, dtype=jnp.float32), _tri_ones(OUT_PER_BRANCH))  # (32, 32)
    gamma = jnp.concatenate(bn_gammas)
    beta = jnp.concatenate(bn_betas)
    mean = jnp.concatenate(bn_means)
    var = jnp.concatenate(bn_vars)
    scale = gamma / jnp.sqrt(var + BN_EPS)               # (32,)
    shift = beta - mean * scale                          # (32,)

    w_fold = jnp.matmul(w_big, a_c, precision=hi) * scale[None, :] / 9.0     # (PK, 32)
    b_row = jnp.matmul(a_c, bias_all, precision=hi) * scale / 9.0            # (32,)

    # ---- fold the bias map into the GEMM: rows carry [pooled patch, rowsum(A_t)[t], 1] ----
    rs = jnp.sum(_tri_ones(T), axis=1)                   # (T,)  2 at edges, 3 interior
    M = B * T
    q2d = q.reshape(M, PK)
    q_aug = jnp.concatenate(
        [q2d, jnp.tile(rs, B)[:, None], jnp.ones((M, 1), jnp.float32)], axis=1)  # (M, PK+2)
    w_aug = jnp.concatenate([w_fold, b_row[None, :], shift[None, :]], axis=0)    # (PK+2, 32)

    # ---- tile the collapsed (B*T) dimension along the lane axis ----
    m_chunks = (M + 127) // 128
    if m_chunks >= 16:
        tile_m = 1024
    elif m_chunks >= 8:
        tile_m = 512
    elif m_chunks >= 2:
        tile_m = (m_chunks // 2) * 128    # aim for >=2 grid steps (v7x megacore)
    else:
        tile_m = 128
    M_pad = _round_up(M, tile_m)
    grid_m = M_pad // tile_m

    # Transposed GEMM operands (cast to the streaming dtype only at the pallas_call boundary
    # so the only materialized HBM intermediate is half-width when compute_dtype=bf16).
    pt = jnp.pad(q_aug, ((0, M_pad - M), (0, K_pad - K_aug))).T.astype(compute_dtype)  # (Kp, M_pad)
    wt = jnp.pad(w_aug, ((0, K_pad - K_aug), (0, 0))).T.astype(compute_dtype)          # (32, Kp)

    itemsize = jnp.dtype(compute_dtype).itemsize
    cost = pl.CostEstimate(
        flops=2 * C_OUT * K_pad * M_pad,
        transcendentals=0,
        bytes_accessed=K_pad * M_pad * itemsize + C_OUT * K_pad * itemsize + C_OUT * M_pad * 4,
    )

    out_cm = pl.pallas_call(
        mscnn_gemm_kernel,
        out_shape=jax.ShapeDtypeStruct((C_OUT, M_pad), jnp.float32),
        grid=(grid_m,),
        in_specs=[
            pl.BlockSpec((C_OUT, K_pad), lambda m: (0, 0)),   # resident folded weight
            pl.BlockSpec((K_pad, tile_m), lambda m: (0, m)),  # streamed patch columns
        ],
        out_specs=pl.BlockSpec((C_OUT, tile_m), lambda m: (0, m)),
        compiler_params=pltpu.CompilerParams(dimension_semantics=("parallel",)),
        cost_estimate=cost,
    )(wt, pt)

    # Channel-major result: column b*T + t holds out[b, :, t]  ->  torch layout (B, 32, T).
    out = out_cm[:, :M].reshape(C_OUT, B, T)
    return jnp.transpose(out, (1, 0, 2))


def mscnn_reference(x, conv_ws, conv_bs, bn_gammas, bn_betas, bn_means, bn_vars,
                    window_size, features):
    """Direct, unfused JAX translation of the torch module (eval-mode BN)."""
    B = x.shape[0]
    F, L = features, window_size
    stride = 10 if window_size % 10 == 0 else 16
    hi = jax.lax.Precision.HIGHEST
    xr = x.reshape(B, F, L).astype(jnp.float32)
    outs = []
    for bi, k in enumerate(KS):
        T = (L - k) // stride + 1
        cols = [jnp.einsum('bfk,ofk->bo', xr[:, :, t * stride:t * stride + k],
                           conv_ws[bi], precision=hi) + conv_bs[bi] for t in range(T)]
        conv = jnp.stack(cols, axis=-1)                   # (B, 8, T)
        cp = jnp.pad(conv, ((0, 0), (1, 1), (1, 1)))
        pooled = sum(cp[:, i:i + OUT_PER_BRANCH, j:j + T]
                     for i in range(3) for j in range(3)) / 9.0
        y = (pooled - bn_means[bi][None, :, None]) / jnp.sqrt(bn_vars[bi][None, :, None] + BN_EPS)
        y = y * bn_gammas[bi][None, :, None] + bn_betas[bi][None, :, None]
        outs.append(y)
    return jnp.concatenate(outs, axis=1)                  # (B, 32, T)


if __name__ == "__main__":
    # Small shapes consistent with the module: window_size % 10 == 0 -> stride 10, T = 10.
    B, WINDOW, FEAT = 2, 100, 4

    key = jax.random.PRNGKey(0)
    keys = jax.random.split(key, 1 + 6 * len(KS))
    x = jax.random.normal(keys[0], (B, WINDOW, FEAT), dtype=jnp.float32)

    conv_ws, conv_bs, bn_gammas, bn_betas, bn_means, bn_vars = [], [], [], [], [], []
    for bi, k in enumerate(KS):
        kw, kb, kg, kbe, km, kv = keys[1 + 6 * bi: 1 + 6 * (bi + 1)]
        bound = 1.0 / (FEAT * k) ** 0.5   # torch Conv1d default init bound
        conv_ws.append(jax.random.uniform(kw, (OUT_PER_BRANCH, FEAT, k), jnp.float32, -bound, bound))
        conv_bs.append(jax.random.uniform(kb, (OUT_PER_BRANCH,), jnp.float32, -bound, bound))
        bn_gammas.append(jax.random.uniform(kg, (OUT_PER_BRANCH,), jnp.float32, 0.5, 1.5))
        bn_betas.append(jax.random.uniform(kbe, (OUT_PER_BRANCH,), jnp.float32, -0.5, 0.5))
        bn_means.append(jax.random.normal(km, (OUT_PER_BRANCH,), jnp.float32) * 0.1)
        bn_vars.append(jax.random.uniform(kv, (OUT_PER_BRANCH,), jnp.float32, 0.5, 1.5))

    ref = mscnn_reference(x, conv_ws, conv_bs, bn_gammas, bn_betas, bn_means, bn_vars,
                          WINDOW, FEAT)
    T = (WINDOW - 1) // 10 + 1

    # Primary (perf) path: bf16 streaming with f32 MXU accumulation.
    out_bf16 = mscnn_forward(x, conv_ws, conv_bs, bn_gammas, bn_betas, bn_means, bn_vars,
                             WINDOW, FEAT, compute_dtype=jnp.bfloat16)
    out_bf16 = jax.block_until_ready(out_bf16)
    assert out_bf16.shape == (B, C_OUT, T), out_bf16.shape
    # bf16 operand quantization gives ~1e-3-level absolute error; 2e-2 is far below any real bug.
    assert jnp.allclose(out_bf16, ref, atol=2e-2, rtol=2e-2), \
        ("bf16 max abs diff", float(jnp.max(jnp.abs(out_bf16 - ref))))

    # Full-precision path: validates the folding/GEMM structure to tight tolerance.
    out_f32 = mscnn_forward(x, conv_ws, conv_bs, bn_gammas, bn_betas, bn_means, bn_vars,
                            WINDOW, FEAT, compute_dtype=jnp.float32)
    out_f32 = jax.block_until_ready(out_f32)
    assert out_f32.shape == (B, C_OUT, T), out_f32.shape
    assert jnp.allclose(out_f32, ref, atol=2e-3, rtol=2e-3), \
        ("f32 max abs diff", float(jnp.max(jnp.abs(out_f32 - ref))))

    print("KERNEL_OK")
</pallas_src>

<mosaic_0001>
module attributes {stable_mosaic.version = 11 : i64} {
  func.func @mscnn_gemm_kernel(%arg0: i32, %arg1: memref<32x80xbf16, #tpu.memory_space<vmem>>, %arg2: memref<80x128xbf16, #tpu.memory_space<vmem>>, %arg3: memref<32x128xf32, #tpu.memory_space<vmem>>) attributes {dimension_semantics = [#tpu.dimension_semantics<parallel>], iteration_bounds = array<i64: 1>, scalar_prefetch = 0 : i64, scratch_operands = 0 : i64, tpu.core_type = #tpu.core_type<tc>, window_params = [{pipeline_mode = #tpu.pipeline_mode<synchronous>, transform_indices = @transform_0, window_bounds = array<i64: 32, 80>}, {transform_indices = @transform_1, window_bounds = array<i64: 80, 128>}, {transform_indices = @transform_2, window_bounds = array<i64: 32, 128>}]} {
    %c0 = arith.constant 0 : index
    %c0_0 = arith.constant 0 : index
    %0 = vector.load %arg1[%c0, %c0_0] : memref<32x80xbf16, #tpu.memory_space<vmem>>, vector<32x80xbf16>
    %c0_1 = arith.constant 0 : index
    %c0_2 = arith.constant 0 : index
    %1 = vector.load %arg2[%c0_1, %c0_2] : memref<80x128xbf16, #tpu.memory_space<vmem>>, vector<80x128xbf16>
    %cst = arith.constant dense<0.000000e+00> : vector<32x128xf32>
    %2 = tpu.matmul %0, %1, %cst {dimension_numbers = #tpu.dot_dimension_numbers<[1], [0], [0], [1], [0, 0, 1, 1], [], []>} : vector<32x80xbf16>, vector<80x128xbf16>, vector<32x128xf32> -> vector<32x128xf32>
    %c0_3 = arith.constant 0 : index
    %c0_4 = arith.constant 0 : index
    %3 = vector.load %arg3[%c0_3, %c0_4] : memref<32x128xf32, #tpu.memory_space<vmem>>, vector<32x128xf32>
    tpu.vector_store %arg3[%c0_3, %c0_4], %2 {strides = array<i32>} : memref<32x128xf32, #tpu.memory_space<vmem>>, vector<32x128xf32>,
    return
  }
  func.func @transform_0(%arg0: i32) -> (i32, i32) {
    %c0_i32 = arith.constant 0 : i32
    %c0_i32_0 = arith.constant 0 : i32
    %c0_i32_1 = arith.constant 0 : i32
    return %c0_i32, %c0_i32_0 : i32, i32
  }
  func.func @transform_1(%arg0: i32) -> (i32, i32) {
    %c0_i32 = arith.constant 0 : i32
    %c0_i32_0 = arith.constant 0 : i32
    return %c0_i32, %arg0 : i32, i32
  }
  func.func @transform_2(%arg0: i32) -> (i32, i32) {
    %c0_i32 = arith.constant 0 : i32
    %c0_i32_0 = arith.constant 0 : i32
    return %c0_i32, %arg0 : i32, i32
  }
}

</mosaic_0001>

<bundles_post_ra>
// kernel: tpu_custom_call.1
= control target key start
LH: loop header
LB: loop body
LE: loop exit
PB: predicated region body
PF: predicated region fallthrough
CT: control target
= control target key end

     0   :  { %7 = vsyncpa [#allocation3], 0  ;;  %s314_s0 = inlined_call_operand.hbm [shape: bf16[32,80], index: 0, kind: input, shape index: {}]   ;;  %s315_s1 = inlined_call_operand.hbm [shape: bf16[80,128], index: 1, kind: input, shape index: {}]   ;;  %s316_s2 = inlined_call_operand.hbm [shape: f32[32,128], index: 2, kind: output, shape index: {}]  }
   0x1   :  { %8 = vsyncpa [#allocation6], 0 }
   0x2   :  { %9 = vsyncpa [#allocation4], 0  ;;  %s283_s9 = smov [#allocation2]  }
   0x3   :  { %s15_s10 = sshll.u32 %s283_s9, 4  ;;  %s16_s10 = int_to_ptr.vmem [resolvable:$true] %s15_s10 }
   0x4   :  { %s225_s11 = scalar_lea.vmem %s16_s10, 256  ;;  %p230_p1 = scmp.lt.s32.totalorder %s16_s10, %s16_s10 }
   0x5   :  { %p226_p0 = scmp.ne.s32.totalorder %s16_s10, %s225_s11  ;;  %p231_p2 = scmp.lt.s32.totalorder %s225_s11, %s225_s11 }
   0x7   :  { %p232_p3 = por %p231_p2, %p230_p1 }
   0x9   :  { %p233_p4 = pnand %p232_p3, %p226_p0 }
   0xb   :  { %236 = shalt.err (!%p233_p4)
}
   0xc   :  { %s284_s12 = smov 64   ;;  %s285_s13 = smov 4  }
   0xd   :  { %21 = dma.hbm_to_vmem [thread:$0]  %s314_s0, 256, %s16_s10, [#allocation3], %s284_s12, %s284_s12, %s285_s13  }
   0xe   :  { %s286_s16 = smov [#allocation5]  }
   0xf   :  { %s27_s17 = sshll.u32 %s286_s16, 4  ;;  %s28_s17 = int_to_ptr.vmem [resolvable:$true] %s27_s17 }
  0x10   :  { %s245_s18 = scalar_lea.vmem %s28_s17, 640  ;;  %p250_p6 = scmp.lt.s32.totalorder %s28_s17, %s28_s17 }
  0x11   :  { %p246_p5 = scmp.ne.s32.totalorder %s28_s17, %s245_s18  ;;  %p251_p7 = scmp.lt.s32.totalorder %s245_s18, %s245_s18 }
  0x13   :  { %p252_p8 = por %p251_p7, %p250_p6 }
  0x15   :  { %p253_p9 = pnand %p252_p8, %p246_p5 }
  0x17   :  { %256 = shalt.err (!%p253_p9)
}
  0x18   :  { %33 = dma.hbm_to_vmem [thread:$0]  %s315_s1, 640, %s28_s17, [#allocation6], %s284_s12, %s284_s12, %s285_s13  }
  0x19   :  { %277 = dma.done.wait [#allocation3], 256  }
  0x1a   :  { %278 = vsyncadd [#allocation3], 4294967040 }
  0x1b   :  { %279 = dma.done.wait [#allocation6], 640  }
  0x1c   :  { %280 = vsyncadd [#allocation6], 4294966656  ;;  %v210_v0 = vld [vmem:[#allocation5 + $0x20] sm:$0xff]   ;;  %v211_v1 = vld [vmem:[#allocation5 + $0x18] sm:$0xff]   ;;  %vm95_vm0 = vcmask 654336   ;;  %s287_s0 = smov [#allocation7]  }
  0x1d   :  { %189 = vmatprep.subr.bf16.mxu0 %v210_v0  ;;  %v212_v2 = vld [vmem:[#allocation5 + $0x10] sm:$0xff]   ;;  %v213_v4 = vld [vmem:[#allocation5 + $0x8] sm:$0xff]   ;;  %v214_v5 = vld [vmem:[#allocation5] sm:$0xff]   ;;  %s160_s1 = sshll.u32 %s287_s0, 4  ;;  %s161_s1 = int_to_ptr.vmem [resolvable:$true] %s160_s1 }
  0x1e   :  { %190 = vmatpush3.bf16.msra.mxu0 %v210_v0  ;;  %v215_v3 = vld [vmem:[#allocation2] sm:$0xff]   ;;  %v216_v6 = vld [vmem:[#allocation2 + $0x8] sm:$0xff]   ;;  %s257_s21 = scalar_lea.vmem %s161_s1, 512  ;;  %p262_p11 = scmp.lt.s32.totalorder %s161_s1, %s161_s1 }
  0x1f   :  { %191 = vmatprep.subr.bf16.mxu0 %v211_v1  ;;  %199 = vmatprep.mubr.msk.bf16.mxu0 %vm95_vm0, %v215_v3  ;;  %p258_p10 = scmp.ne.s32.totalorder %s161_s1, %s257_s21  ;;  %p263_p12 = scmp.lt.s32.totalorder %s257_s21, %s257_s21 }
  0x21   :  { %p264_p13 = por %p263_p12, %p262_p11 }
  0x22   :  { %192 = vmatpush3.bf16.msra.mxu0 %v211_v1 }
  0x23   :  { %193 = vmatprep.subr.bf16.mxu0 %v212_v2  ;;  %p265_p0 = pnand %p264_p13, %p258_p10 }
  0x26   :  { %194 = vmatpush3.bf16.msra.mxu0 %v212_v2 }
  0x27   :  { %195 = vmatprep.subr.bf16.mxu0 %v213_v4 }
  0x2a   :  { %196 = vmatpush3.bf16.msra.mxu0 %v213_v4 }
  0x2b   :  { %197 = vmatprep.subr.bf16.mxu0 %v214_v5 }
  0x2e   :  { %198 = vmatpush3.bf16.msra.mxu0 %v214_v5 }
  0x31   :  { %200 = vmatmul.mubr.msk.bf16.vlgmr.msra.gmra.mxu0 %vm95_vm0, %v216_v6 }
  0xf1   :  { %v201_v7 = vpop.f32.mrf.mxu0 }
  0xf2   :  { %153 = vst [vmem:[#allocation7 + $0x10] sm:$0xff] %v201_v7 }
  0xf3   :  { %v136_v8 = vpop.f32.mrf.mxu0 }
  0xf4   :  { %151 = vst [vmem:[#allocation7] sm:$0xff] %v136_v8 }
  0xf5   :  { %v202_v9 = vpop.f32.mrf.mxu0 }
  0xf6   :  { %154 = vst [vmem:[#allocation7 + $0x18] sm:$0xff] %v202_v9 }
  0xf7   :  { %v139_v10 = vpop.f32.mrf.mxu0 }
  0xf8   :  { %152 = vst [vmem:[#allocation7 + $0x8] sm:$0xff] %v139_v10 }
  0xf9   :  { %268 = shalt.err (!%p265_p0)
}
  0xfa   :  { %s288_s22 = smov 128   ;;  %s289_s23 = smov 8  }
  0xfb   :  { %166 = dma.vmem_to_hbm [thread:$0]  %s161_s1, 512, %s316_s2, [#allocation4], %s288_s22, %s288_s22, %s289_s23  }
  0xfc   :  { %281 = dma.done.wait [#allocation4], 512  }
  0xfd   :  { %282 = vsyncadd [#allocation4], 4294966784 }
  0xfe   :  { %170 = vsyncpa [#allocation3], 1 }
  0xff   :  { %171 = vsyncpa [#allocation6], 1 }
 0x100   :  { %172 = vsyncpa [#allocation4], 1 }

</bundles_post_ra>
